<compile_context>
chip_gen: v6e
topology: v6e:2x2x1
jax: 0.10.0
libtpu: 0.0.40
codegen_flags: <defaults>
</compile_context>

<pallas_src>
import functools

import jax
import jax.numpy as jnp
from jax.experimental import pallas as pl
from jax.experimental.pallas import tpu as pltpu


def esm_linear_kernel(x_ref, w_ref, b_ref, o_ref):
    # x_ref: (tm, D) storage dtype (f32), w_ref: (D, D) compute dtype (bf16),
    # b_ref: (1, D) f32, o_ref: (tm, D) out_dtype.
    x = x_ref[...].astype(w_ref.dtype)  # in-kernel cast; x DMA'd as-is
    acc = jnp.dot(x, w_ref[...], preferred_element_type=jnp.float32)
    o_ref[...] = (acc + b_ref[...]).astype(o_ref.dtype)


def esm_init_params(weight, bias, *, use_bf16: bool = True):
    """One-time (outside-jit) parameter prep.

    weight: [out, in] PyTorch nn.Linear layout.
    Returns (weight_t, bias): weight_t = W.T ([in, out]) in bf16 (or f32 when
    use_bf16=False, for callers needing closer f32 parity).
    """
    weight_t = jnp.asarray(weight).T
    if use_bf16:
        weight_t = weight_t.astype(jnp.bfloat16)
    return weight_t, jnp.asarray(bias, dtype=jnp.float32)


@functools.partial(jax.jit, static_argnames=("tm", "out_dtype"))
def esm_forward(x, weight_t, bias, *, tm: int = 512, out_dtype=jnp.float32):
    """y = x @ weight_t + bias   (== torch nn.Linear forward with W = weight_t.T).

    x:        [M, D]  (any float dtype; cast to weight_t.dtype inside kernel)
    weight_t: [D, D]  transposed weight, ideally pre-cast to bf16 via esm_init_params
    bias:     [D]     f32
    """
    M, D = x.shape
    assert weight_t.shape == (D, D)
    assert bias.shape == (D,)
    assert D % 128 == 0, "embedding_dim must be a multiple of 128 for lane tiling"

    if M <= tm:
        # Single block; block_shape equals full array dims, so any M is legal.
        tm_eff = M
    else:
        # Multiple row tiles; ragged last block is masked by Pallas.
        tm_eff = tm
        assert tm_eff % 8 == 0, "row tile must be a multiple of 8 sublanes"

    grid = (pl.cdiv(M, tm_eff),)

    bias2d = bias.reshape(1, D).astype(jnp.float32)

    out_itemsize = jnp.dtype(out_dtype).itemsize
    cost = pl.CostEstimate(
        flops=2 * M * D * D,
        transcendentals=0,
        bytes_accessed=(
            M * D * x.dtype.itemsize            # x, DMA'd as stored
            + D * D * weight_t.dtype.itemsize   # weight, resident (read once)
            + D * 4                             # bias
            + M * D * out_itemsize              # output
        ),
    )

    y = pl.pallas_call(
        esm_linear_kernel,
        out_shape=jax.ShapeDtypeStruct((M, D), out_dtype),
        grid_spec=pl.GridSpec(
            grid=grid,
            in_specs=[
                pl.BlockSpec((tm_eff, D), lambda i: (i, 0)),  # x row tile
                pl.BlockSpec((D, D), lambda i: (0, 0)),       # full weight, resident
                pl.BlockSpec((1, D), lambda i: (0, 0)),       # bias row
            ],
            out_specs=pl.BlockSpec((tm_eff, D), lambda i: (i, 0)),
        ),
        compiler_params=pltpu.CompilerParams(
            dimension_semantics=("parallel",),       # shards row tiles across TCs (v7x)
            vmem_limit_bytes=32 * 1024 * 1024,       # > v5e's 16 MiB default scoped VMEM
        ),
        cost_estimate=cost,
    )(x, weight_t, bias2d)

    return y


if __name__ == "__main__":
    # Shapes consistent with the module: embedding_dim = 768 (nn.Linear(768, 768)),
    # a small batch of 16 embeddings.
    embedding_dim = 768
    batch = 16

    key = jax.random.PRNGKey(0)
    k_x, k_w, k_b, k_x2 = jax.random.split(key, 4)

    # PyTorch Linear shapes: W [out, in], b [out].
    w_torch = jax.random.normal(
        k_w, (embedding_dim, embedding_dim), dtype=jnp.float32) * 0.02
    bias = jax.random.normal(k_b, (embedding_dim,), dtype=jnp.float32) * 0.02
    x = jax.random.normal(k_x, (batch, embedding_dim), dtype=jnp.float32)

    # One-time parameter prep (outside jit): transpose + bf16 cast of the weight.
    weight_t_bf16, bias_p = esm_init_params(w_torch, bias, use_bf16=True)

    # Small-batch path (single block).
    y = jax.block_until_ready(esm_forward(x, weight_t_bf16, bias_p))

    # Reference with matching bf16 quantization of x and W, f32 accumulation.
    x_q = x.astype(jnp.bfloat16).astype(jnp.float32)
    w_q = weight_t_bf16.astype(jnp.float32)
    y_ref = x_q @ w_q + bias[None, :]
    assert y.shape == (batch, embedding_dim)
    assert jnp.allclose(y, y_ref, atol=1e-3, rtol=1e-3), "mismatch vs bf16 reference"

    # Loose sanity check against the full-f32 nn.Linear result.
    y_f32 = x @ w_torch.T + bias[None, :]
    assert jnp.allclose(y, y_f32, atol=5e-2, rtol=5e-2), "mismatch vs f32 reference"

    # Exercise the multi-tile path with a ragged last block (M > tm, M % tm != 0).
    big_batch = 200
    x_big = jax.random.normal(k_x2, (big_batch, embedding_dim), dtype=jnp.float32)
    y_big = jax.block_until_ready(esm_forward(x_big, weight_t_bf16, bias_p, tm=64))
    y_big_ref = x_big.astype(jnp.bfloat16).astype(jnp.float32) @ w_q + bias[None, :]
    assert y_big.shape == (big_batch, embedding_dim)
    assert jnp.allclose(y_big, y_big_ref, atol=1e-3, rtol=1e-3), "mismatch (tiled path)"

    # f32-weight path (use_bf16=False) for callers wanting closer f32 parity.
    # TODO(synk): default MXU precision may still use reduced-precision passes;
    # tolerance kept loose here.
    weight_t_f32, _ = esm_init_params(w_torch, bias, use_bf16=False)
    y_exact = jax.block_until_ready(esm_forward(x, weight_t_f32, bias_p))
    assert jnp.allclose(y_exact, y_f32, atol=5e-2, rtol=5e-2), "mismatch (f32 path)"

    print("KERNEL_OK")
</pallas_src>

<mosaic_0001>
module attributes {stable_mosaic.version = 11 : i64} {
  func.func @esm_linear_kernel(%arg0: i32, %arg1: memref<16x768xf32, #tpu.memory_space<vmem>>, %arg2: memref<768x768xbf16, #tpu.memory_space<vmem>>, %arg3: memref<1x768xf32, #tpu.memory_space<vmem>>, %arg4: memref<16x768xf32, #tpu.memory_space<vmem>>) attributes {dimension_semantics = [#tpu.dimension_semantics<parallel>], iteration_bounds = array<i64: 1>, scalar_prefetch = 0 : i64, scratch_operands = 0 : i64, tpu.core_type = #tpu.core_type<tc>, window_params = [{transform_indices = @transform_0, window_bounds = array<i64: 16, 768>}, {pipeline_mode = #tpu.pipeline_mode<synchronous>, transform_indices = @transform_1, window_bounds = array<i64: 768, 768>}, {pipeline_mode = #tpu.pipeline_mode<synchronous>, transform_indices = @transform_2, window_bounds = array<i64: 1, 768>}, {transform_indices = @transform_3, window_bounds = array<i64: 16, 768>}]} {
    %c0 = arith.constant 0 : index
    %c0_0 = arith.constant 0 : index
    %0 = vector.load %arg1[%c0, %c0_0] : memref<16x768xf32, #tpu.memory_space<vmem>>, vector<16x768xf32>
    %1 = arith.truncf %0 : vector<16x768xf32> to vector<16x768xbf16>
    %c0_1 = arith.constant 0 : index
    %c0_2 = arith.constant 0 : index
    %2 = vector.load %arg2[%c0_1, %c0_2] : memref<768x768xbf16, #tpu.memory_space<vmem>>, vector<768x768xbf16>
    %cst = arith.constant dense<0.000000e+00> : vector<16x768xf32>
    %3 = tpu.matmul %1, %2, %cst {dimension_numbers = #tpu.dot_dimension_numbers<[1], [0], [0], [1], [0, 0, 1, 1], [], []>} : vector<16x768xbf16>, vector<768x768xbf16>, vector<16x768xf32> -> vector<16x768xf32>
    %c0_3 = arith.constant 0 : index
    %c0_4 = arith.constant 0 : index
    %4 = vector.load %arg3[%c0_3, %c0_4] : memref<1x768xf32, #tpu.memory_space<vmem>>, vector<1x768xf32>
    %5 = vector.broadcast %4 : vector<1x768xf32> to vector<16x768xf32>
    %6 = arith.addf %3, %5 : vector<16x768xf32>
    %c0_5 = arith.constant 0 : index
    %c0_6 = arith.constant 0 : index
    %7 = vector.load %arg4[%c0_5, %c0_6] : memref<16x768xf32, #tpu.memory_space<vmem>>, vector<16x768xf32>
    tpu.vector_store %arg4[%c0_5, %c0_6], %6 {strides = array<i32>} : memref<16x768xf32, #tpu.memory_space<vmem>>, vector<16x768xf32>,
    return
  }
  func.func @transform_0(%arg0: i32) -> (i32, i32) {
    %c0_i32 = arith.constant 0 : i32
    %c0_i32_0 = arith.constant 0 : i32
    return %arg0, %c0_i32 : i32, i32
  }
  func.func @transform_1(%arg0: i32) -> (i32, i32) {
    %c0_i32 = arith.constant 0 : i32
    %c0_i32_0 = arith.constant 0 : i32
    %c0_i32_1 = arith.constant 0 : i32
    return %c0_i32, %c0_i32_0 : i32, i32
  }
  func.func @transform_2(%arg0: i32) -> (i32, i32) {
    %c0_i32 = arith.constant 0 : i32
    %c0_i32_0 = arith.constant 0 : i32
    %c0_i32_1 = arith.constant 0 : i32
    return %c0_i32, %c0_i32_0 : i32, i32
  }
  func.func @transform_3(%arg0: i32) -> (i32, i32) {
    %c0_i32 = arith.constant 0 : i32
    %c0_i32_0 = arith.constant 0 : i32
    return %arg0, %c0_i32 : i32, i32
  }
}

</mosaic_0001>

<bundles_post_ra>
// kernel: esm_forward.1
= control target key start
LH: loop header
LB: loop body
LE: loop exit
PB: predicated region body
PF: predicated region fallthrough
CT: control target
= control target key end

     0   :  { %8 = vsyncpa [#allocation3], 0  ;;  %s3122_s0 = inlined_call_operand.hbm [shape: f32[16,768], index: 0, kind: input, shape index: {}]   ;;  %s3123_s1 = inlined_call_operand.hbm [shape: bf16[768,768], index: 1, kind: input, shape index: {}]   ;;  %s3124_s2 = inlined_call_operand.vmem [shape: f32[1,768], index: 2, kind: input, shape index: {}]   ;;  %s3125_s3 = inlined_call_operand.hbm [shape: f32[16,768], index: 3, kind: output, shape index: {}]  }
   0x1   :  { %9 = vsyncpa [#allocation6], 0 }
   0x2   :  { %10 = vsyncpa [#allocation4], 0  ;;  %s3031_s12 = smov [#allocation2]  }
   0x3   :  { %s16_s13 = sshll.u32 %s3031_s12, 4  ;;  %s17_s13 = int_to_ptr.vmem [resolvable:$true] %s16_s13 }
   0x4   :  { %s2973_s14 = scalar_lea.vmem %s17_s13, 1536  ;;  %p2978_p1 = scmp.lt.s32.totalorder %s17_s13, %s17_s13 }
   0x5   :  { %p2974_p0 = scmp.ne.s32.totalorder %s17_s13, %s2973_s14  ;;  %p2979_p2 = scmp.lt.s32.totalorder %s2973_s14, %s2973_s14 }
   0x7   :  { %p2980_p3 = por %p2979_p2, %p2978_p1 }
   0x9   :  { %p2981_p4 = pnand %p2980_p3, %p2974_p0 }
   0xb   :  { %2984 = shalt.err (!%p2981_p4)
}
   0xc   :  { %s3032_s15 = smov 768   ;;  %s3033_s16 = smov 48  }
   0xd   :  { %22 = dma.hbm_to_vmem [thread:$0]  %s3122_s0, 1536, %s17_s13, [#allocation3], %s3032_s15, %s3032_s15, %s3033_s16  }
   0xe   :  { %s3034_s19 = smov [#allocation5]  }
   0xf   :  { %s28_s20 = sshll.u32 %s3034_s19, 4  ;;  %s29_s20 = int_to_ptr.vmem [resolvable:$true] %s28_s20 }
  0x10   :  { %s2993_s21 = scalar_lea.vmem %s29_s20, 36864  ;;  %p2998_p6 = scmp.lt.s32.totalorder %s29_s20, %s29_s20 }
  0x11   :  { %p2994_p5 = scmp.ne.s32.totalorder %s29_s20, %s2993_s21  ;;  %p2999_p7 = scmp.lt.s32.totalorder %s2993_s21, %s2993_s21 }
  0x13   :  { %p3000_p8 = por %p2999_p7, %p2998_p6 }
  0x15   :  { %p3001_p9 = pnand %p3000_p8, %p2994_p5 }
  0x17   :  { %3004 = shalt.err (!%p3001_p9)
}
  0x18   :  { %s3035_s22 = smov 384   ;;  %s3036_s23 = smov 24  }
  0x19   :  { %34 = dma.hbm_to_vmem [thread:$0]  %s3123_s1, 36864, %s29_s20, [#allocation6], %s3035_s22, %s3035_s22, %s3036_s23  }
  0x1a   :  { %3025 = dma.done.wait [#allocation3], 1536  }
  0x1b   :  { %3026 = vsyncadd [#allocation3], 4294965760 }
  0x1c   :  { %3027 = dma.done.wait [#allocation6], 36864  }
  0x1d   :  { %3028 = vsyncadd [#allocation6], 4294930432  ;;  %v2533_v0 = vld [vmem:[#allocation5 + $0x154] ss:$24 sps:$4 sm:$0xff]   ;;  %v2535_v1 = vld [vmem:[#allocation5 + $0x150] ss:$24 sps:$4 sm:$0xff]  }
  0x1e   :  { %1821 = vmatprep.subr.bf16.mxu0 %v2533_v0  ;;  %v2536_v2 = vld [vmem:[#allocation5 + $0x454] ss:$24 sps:$4 sm:$0xff]   ;;  %v2538_v3 = vld [vmem:[#allocation5 + $0x450] ss:$24 sps:$4 sm:$0xff]   ;;  %v2539_v4 = vld [vmem:[#allocation5 + $0x124] ss:$24 sps:$4 sm:$0xff]  }
  0x1f   :  { %1822 = vmatpush1.bf16.msra.mxu0 %v2535_v1  ;;  %v2541_v5 = vld [vmem:[#allocation5 + $0x120] ss:$24 sps:$4 sm:$0xff]   ;;  %1864 = vmatprep.subr.bf16.mxu1 %v2536_v2  ;;  %v2542_v6 = vld [vmem:[#allocation5 + $0x424] ss:$24 sps:$4 sm:$0xff]   ;;  %v2545_v8 = vld [vmem:[#allocation5 + $0xf4] ss:$24 sps:$4 sm:$0xff]  }
  0x20   :  { %1865 = vmatpush1.bf16.msra.mxu1 %v2538_v3  ;;  %1823 = vmatprep.subr.bf16.mxu0 %v2539_v4  ;;  %v2544_v7 = vld [vmem:[#allocation5 + $0x420] ss:$24 sps:$4 sm:$0xff]   ;;  %v2547_v9 = vld [vmem:[#allocation5 + $0xf0] ss:$24 sps:$4 sm:$0xff]   ;;  %v2548_v10 = vld [vmem:[#allocation5 + $0x3f4] ss:$24 sps:$4 sm:$0xff]  }
  0x21   :  { %1866 = vmatprep.subr.bf16.mxu1 %v2542_v6  ;;  %v2551_v11 = vld [vmem:[#allocation5 + $0xc4] ss:$24 sps:$4 sm:$0xff]   ;;  %v2550_v12 = vld [vmem:[#allocation5 + $0x3f0] ss:$24 sps:$4 sm:$0xff]   ;;  %v2553_v14 = vld [vmem:[#allocation5 + $0xc0] ss:$24 sps:$4 sm:$0xff]  }
  0x22   :  { %v2554_v13 = vld [vmem:[#allocation5 + $0x3c4] ss:$24 sps:$4 sm:$0xff]   ;;  %v2557_v15 = vld [vmem:[#allocation5 + $0x94] ss:$24 sps:$4 sm:$0xff]   ;;  %v2556_v16 = vld [vmem:[#allocation5 + $0x3c0] ss:$24 sps:$4 sm:$0xff]  }
  0x23   :  { %1824 = vmatpush1.bf16.msra.mxu0 %v2541_v5  ;;  %v2560_v17 = vld [vmem:[#allocation5 + $0x394] ss:$24 sps:$4 sm:$0xff]   ;;  %v2559_v18 = vld [vmem:[#allocation5 + $0x90] ss:$24 sps:$4 sm:$0xff]   ;;  %v2563_v19 = vld [vmem:[#allocation5 + $0x64] ss:$24 sps:$4 sm:$0xff]  }
  0x24   :  { %1825 = vmatprep.subr.bf16.mxu0 %v2545_v8  ;;  %1867 = vmatpush1.bf16.msra.mxu1 %v2544_v7  ;;  %v2562_v20 = vld [vmem:[#allocation5 + $0x390] ss:$24 sps:$4 sm:$0xff]   ;;  %v2566_v21 = vld [vmem:[#allocation5 + $0x364] ss:$24 sps:$4 sm:$0xff]   ;;  %v2565_v22 = vld [vmem:[#allocation5 + $0x60] ss:$24 sps:$4 sm:$0xff]  }
  0x25   :  { %1868 = vmatprep.subr.bf16.mxu1 %v2548_v10  ;;  %v2569_v23 = vld [vmem:[#allocation5 + $0x34] ss:$24 sps:$4 sm:$0xff]   ;;  %v2568_v24 = vld [vmem:[#allocation5 + $0x360] ss:$24 sps:$4 sm:$0xff]   ;;  %v2571_v26 = vld [vmem:[#allocation5 + $0x30] ss:$24 sps:$4 sm:$0xff]  }
  0x26   :  { %v2572_v25 = vld [vmem:[#allocation5 + $0x334] ss:$24 sps:$4 sm:$0xff]   ;;  %v2575_v27 = vld [vmem:[#allocation5 + $0x4] ss:$24 sps:$4 sm:$0xff]   ;;  %v2574_v28 = vld [vmem:[#allocation5 + $0x330] ss:$24 sps:$4 sm:$0xff]  }
  0x27   :  { %1826 = vmatpush1.bf16.msra.mxu0 %v2547_v9  ;;  %v2578_v29 = vld [vmem:[#allocation5 + $0x304] ss:$24 sps:$4 sm:$0xff]   ;;  %v2577_v30 = vld [vmem:[#allocation5] ss:$24 sps:$4 sm:$0xff]   ;;  %v2581_v31 = vld [vmem:[#allocation5 + $0x2d4] ss:$24 sps:$4 sm:$0xff]  }
  0x28   :  { %1827 = vmatprep.subr.bf16.mxu0 %v2551_v11  ;;  %1869 = vmatpush1.bf16.msra.mxu1 %v2550_v12  ;;  %v2580_v32 = vld [vmem:[#allocation5 + $0x300] ss:$24 sps:$4 sm:$0xff]   ;;  %v2584_v33 = vld [vmem:[#allocation5 + $0x5d4] ss:$24 sps:$4 sm:$0xff]   ;;  %v2583_v34 = vld [vmem:[#allocation5 + $0x2d0] ss:$24 sps:$4 sm:$0xff]  }
  0x29   :  { %1870 = vmatprep.subr.bf16.mxu1 %v2554_v13  ;;  %v2587_v35 = vld [vmem:[#allocation5 + $0x2a4] ss:$24 sps:$4 sm:$0xff]   ;;  %v2586_v36 = vld [vmem:[#allocation5 + $0x5d0] ss:$24 sps:$4 sm:$0xff]   ;;  %v2589_v38 = vld [vmem:[#allocation5 + $0x2a0] ss:$24 sps:$4 sm:$0xff]  }
  0x2a   :  { %v2590_v37 = vld [vmem:[#allocation5 + $0x5a4] ss:$24 sps:$4 sm:$0xff]   ;;  %v2593_v39 = vld [vmem:[#allocation5 + $0x274] ss:$24 sps:$4 sm:$0xff]   ;;  %v2592_v40 = vld [vmem:[#allocation5 + $0x5a0] ss:$24 sps:$4 sm:$0xff]  }
  0x2b   :  { %1828 = vmatpush1.bf16.msra.mxu0 %v2553_v14  ;;  %v2596_v41 = vld [vmem:[#allocation5 + $0x574] ss:$24 sps:$4 sm:$0xff]   ;;  %v2595_v42 = vld [vmem:[#allocation5 + $0x270] ss:$24 sps:$4 sm:$0xff]   ;;  %v2599_v43 = vld [vmem:[#allocation5 + $0x244] ss:$24 sps:$4 sm:$0xff]  }
  0x2c   :  { %1829 = vmatprep.subr.bf16.mxu0 %v2557_v15  ;;  %1871 = vmatpush1.bf16.msra.mxu1 %v2556_v16  ;;  %v2598_v44 = vld [vmem:[#allocation5 + $0x570] ss:$24 sps:$4 sm:$0xff]   ;;  %v2602_v45 = vld [vmem:[#allocation5 + $0x544] ss:$24 sps:$4 sm:$0xff]   ;;  %v2601_v48 = vld [vmem:[#allocation5 + $0x240] ss:$24 sps:$4 sm:$0xff]  }
  0x2d   :  { %1872 = vmatprep.subr.bf16.mxu1 %v2560_v17  ;;  %v44_v46 = vld [vmem:[#allocation2 + $0x8] sm:$0xff]  ;;  %v50_v47 = vld [vmem:[#allocation2 + $0x38] sm:$0xff]  ;;  %v43_v5 = vld [vmem:[#allocation2] sm:$0xff] }
  0x2e   :  { %v3067_v49 = vpack.c.bf16 %v50_v47, %v44_v46  ;;  %v2605_v50 = vld [vmem:[#allocation5 + $0x214] ss:$24 sps:$4 sm:$0xff]   ;;  %v2604_v51 = vld [vmem:[#allocation5 + $0x540] ss:$24 sps:$4 sm:$0xff]   ;;  %v2607_v56 = vld [vmem:[#allocation5 + $0x210] ss:$24 sps:$4 sm:$0xff]  }
  0x2f   :  { %1830 = vmatpush1.bf16.msra.mxu0 %v2559_v18  ;;  %v46_v52 = vld [vmem:[#allocation2 + $0x18] sm:$0xff]  ;;  %v52_v53 = vld [vmem:[#allocation2 + $0x48] sm:$0xff]  ;;  %v49_v7 = vld [vmem:[#allocation2 + $0x30] sm:$0xff] }
  0x30   :  { %1831 = vmatprep.subr.bf16.mxu0 %v2563_v19  ;;  %1873 = vmatpush1.bf16.msra.mxu1 %v2562_v20  ;;  %v2608_v54 = vld [vmem:[#allocation5 + $0x514] ss:$24 sps:$4 sm:$0xff]   ;;  %v3070_v55 = vpack.c.bf16 %v52_v53, %v46_v52  ;;  %v2611_v57 = vld [vmem:[#allocation5 + $0x1e4] ss:$24 sps:$4 sm:$0xff]   ;;  %v2610_v58 = vld [vmem:[#allocation5 + $0x510] ss:$24 sps:$4 sm:$0xff]   ;;  %v3073_v11 = vpack.c.bf16 %v49_v7, %v43_v5 }
  0x31   :  { %1874 = vmatprep.subr.bf16.mxu1 %v2566_v21  ;;  %1853 = vmatprep.mubr.bf16.mxu0 %v3067_v49  ;;  %v2614_v59 = vld [vmem:[#allocation5 + $0x4e4] ss:$24 sps:$4 sm:$0xff]   ;;  %v2613_v60 = vld [vmem:[#allocation5 + $0x1e0] ss:$24 sps:$4 sm:$0xff]   ;;  %v2617_v61 = vld [vmem:[#allocation5 + $0x1b4] ss:$24 sps:$4 sm:$0xff]  }
  0x32   :  { %1896 = vmatprep.mubr.bf16.mxu1 %v3070_v55  ;;  %v2616_v62 = vld [vmem:[#allocation5 + $0x4e0] ss:$24 sps:$4 sm:$0xff]   ;;  %v2620_v63 = vld [vmem:[#allocation5 + $0x4b4] ss:$24 sps:$4 sm:$0xff]   ;;  %v2619_v0 = vld [vmem:[#allocation5 + $0x1b0] ss:$24 sps:$4 sm:$0xff]  }
  0x33   :  { %1832 = vmatpush1.bf16.msra.mxu0 %v2565_v22  ;;  %v2622_v1 = vld [vmem:[#allocation5 + $0x4b0] ss:$24 sps:$4 sm:$0xff]   ;;  %v2623_v2 = vld [vmem:[#allocation5 + $0x184] ss:$24 sps:$4 sm:$0xff]   ;;  %v2625_v3 = vld [vmem:[#allocation5 + $0x180] ss:$24 sps:$4 sm:$0xff]  }
  0x34   :  { %1833 = vmatprep.subr.bf16.mxu0 %v2569_v23  ;;  %1875 = vmatpush1.bf16.msra.mxu1 %v2568_v24  ;;  %v2626_v4 = vld [vmem:[#allocation5 + $0x484] ss:$24 sps:$4 sm:$0xff]   ;;  %v2628_v6 = vld [vmem:[#allocation5 + $0x480] ss:$24 sps:$4 sm:$0xff]   ;;  %v2631_v8 = vld [vmem:[#allocation5 + $0x754] ss:$24 sps:$4 sm:$0xff]  }
  0x35   :  { %1876 = vmatprep.subr.bf16.mxu1 %v2572_v25  ;;  %v45_v9 = vld [vmem:[#allocation2 + $0x10] sm:$0xff]  ;;  %v51_v10 = vld [vmem:[#allocation2 + $0x40] sm:$0xff] }
  0x36   :  { %v2634_v12 = vld [vmem:[#allocation5 + $0x15c] ss:$24 sps:$4 sm:$0xff]   ;;  %v2629_v13 = vld [vmem:[#allocation5 + $0x750] ss:$24 sps:$4 sm:$0xff]   ;;  %v3075_v14 = vpack.c.bf16 %v51_v10, %v45_v9  ;;  %v2640_v17 = vld [vmem:[#allocation5 + $0x12c] ss:$24 sps:$4 sm:$0xff]  }
  0x37   :  { %1834 = vmatpush1.bf16.msra.mxu0 %v2571_v26  ;;  %v2637_v15 = vld [vmem:[#allocation5 + $0x724] ss:$24 sps:$4 sm:$0xff]   ;;  %v2632_v16 = vld [vmem:[#allocation5 + $0x158] ss:$24 sps:$4 sm:$0xff]   ;;  %v2643_v19 = vld [vmem:[#allocation5 + $0x6f4] ss:$24 sps:$4 sm:$0xff]  }
  0x38   :  { %1835 = vmatprep.subr.bf16.mxu0 %v2575_v27  ;;  %1877 = vmatpush1.bf16.msra.mxu1 %v2574_v28  ;;  %v2635_v18 = vld [vmem:[#allocation5 + $0x720] ss:$24 sps:$4 sm:$0xff]   ;;  %v2646_v21 = vld [vmem:[#allocation5 + $0xfc] ss:$24 sps:$4 sm:$0xff]   ;;  %v2641_v22 = vld [vmem:[#allocation5 + $0x6f0] ss:$24 sps:$4 sm:$0xff]  }
  0x39   :  { %1878 = vmatprep.subr.bf16.mxu1 %v2578_v29  ;;  %v2638_v20 = vld [vmem:[#allocation5 + $0x128] ss:$24 sps:$4 sm:$0xff]   ;;  %v2649_v23 = vld [vmem:[#allocation5 + $0x6c4] ss:$24 sps:$4 sm:$0xff]   ;;  %v2644_v24 = vld [vmem:[#allocation5 + $0xf8] ss:$24 sps:$4 sm:$0xff]  }
  0x3a   :  { %v2652_v25 = vld [vmem:[#allocation5 + $0xcc] ss:$24 sps:$4 sm:$0xff]   ;;  %v2647_v26 = vld [vmem:[#allocation5 + $0x6c0] ss:$24 sps:$4 sm:$0xff]   ;;  %v2658_v29 = vld [vmem:[#allocation5 + $0x9c] ss:$24 sps:$4 sm:$0xff]  }
  0x3b   :  { %1836 = vmatpush1.bf16.msra.mxu0 %v2577_v30  ;;  %v2655_v27 = vld [vmem:[#allocation5 + $0x694] ss:$24 sps:$4 sm:$0xff]   ;;  %v2650_v28 = vld [vmem:[#allocation5 + $0xc8] ss:$24 sps:$4 sm:$0xff]   ;;  %v2680_v52 = vld [vmem:[#allocation5 + $0x2d8] ss:$24 sps:$4 sm:$0xff]  }
  0x3c   :  { %1837 = vmatprep.subr.bf16.mxu0 %v2581_v31  ;;  %1879 = vmatpush1.bf16.msra.mxu1 %v2580_v32  ;;  %v2653_v30 = vld [vmem:[#allocation5 + $0x690] ss:$24 sps:$4 sm:$0xff]   ;;  %v2661_v31 = vld [vmem:[#allocation5 + $0x664] ss:$24 sps:$4 sm:$0xff]   ;;  %v2679_v46 = vld [vmem:[#allocation5 + $0x8d4] ss:$24 sps:$4 sm:$0xff]  }
  0x3d   :  { %1880 = vmatprep.subr.bf16.mxu1 %v2584_v33  ;;  %v2656_v32 = vld [vmem:[#allocation5 + $0x98] ss:$24 sps:$4 sm:$0xff]   ;;  %v2664_v33 = vld [vmem:[#allocation5 + $0x6c] ss:$24 sps:$4 sm:$0xff]   ;;  %v2674_v47 = vld [vmem:[#allocation5 + $0x8] ss:$24 sps:$4 sm:$0xff]  }
  0x3e   :  { %v2688_v53 = vld [vmem:[#allocation5 + $0x2ac] ss:$24 sps:$4 sm:$0xff]   ;;  %v2704_v5 = vld [vmem:[#allocation5 + $0x218] ss:$24 sps:$4 sm:$0xff]   ;;  %v2710_v9 = vld [vmem:[#allocation5 + $0x1e8] ss:$24 sps:$4 sm:$0xff]  }
  0x3f   :  { %1838 = vmatpush2.bf16.msra.mxu0 %v2583_v34  ;;  %v2659_v34 = vld [vmem:[#allocation5 + $0x660] ss:$24 sps:$4 sm:$0xff]   ;;  %v2718_v10 = vld [vmem:[#allocation5 + $0x1bc] ss:$24 sps:$4 sm:$0xff]  }
  0x40   :  { %1839 = vmatprep.subr.bf16.mxu0 %v2587_v35  ;;  %1881 = vmatpush2.bf16.msra.mxu1 %v2586_v36  ;;  %v2667_v35 = vld [vmem:[#allocation5 + $0x634] ss:$24 sps:$4 sm:$0xff]   ;;  %v2662_v36 = vld [vmem:[#allocation5 + $0x68] ss:$24 sps:$4 sm:$0xff]  }
  0x41   :  { %1882 = vmatprep.subr.bf16.mxu1 %v2590_v37  ;;  %v2670_v37 = vld [vmem:[#allocation5 + $0x3c] ss:$24 sps:$4 sm:$0xff]   ;;  %v2707_v7 = vld [vmem:[#allocation5 + $0x7e0] ss:$24 sps:$4 sm:$0xff]  }
  0x43   :  { %1840 = vmatpush2.bf16.msra.mxu0 %v2589_v38  ;;  %v2665_v38 = vld [vmem:[#allocation5 + $0x630] ss:$24 sps:$4 sm:$0xff]  }
  0x44   :  { %1841 = vmatprep.subr.bf16.mxu0 %v2593_v39  ;;  %1883 = vmatpush2.bf16.msra.mxu1 %v2592_v40  ;;  %v2673_v39 = vld [vmem:[#allocation5 + $0x604] ss:$24 sps:$4 sm:$0xff]   ;;  %v48_v40 = vld [vmem:[#allocation2 + $0x28] sm:$0xff] }
  0x45   :  { %1884 = vmatprep.subr.bf16.mxu1 %v2596_v41  ;;  %v54_v41 = vld [vmem:[#allocation2 + $0x58] sm:$0xff] }
  0x47   :  { %1842 = vmatpush2.bf16.msra.mxu0 %v2595_v42  ;;  %v2668_v42 = vld [vmem:[#allocation5 + $0x38] ss:$24 sps:$4 sm:$0xff]  }
  0x48   :  { %1843 = vmatprep.subr.bf16.mxu0 %v2599_v43  ;;  %1885 = vmatpush2.bf16.msra.mxu1 %v2598_v44  ;;  %v3080_v43 = vpack.c.bf16 %v54_v41, %v48_v40  ;;  %v2676_v44 = vld [vmem:[#allocation5 + $0xc] ss:$24 sps:$4 sm:$0xff]   ;;  %v2749_v40 = vld [vmem:[#allocation5 + $0x398] ss:$24 sps:$4 sm:$0xff]  }
  0x49   :  { %1886 = vmatprep.subr.bf16.mxu1 %v2602_v45  ;;  %v2671_v45 = vld [vmem:[#allocation5 + $0x600] ss:$24 sps:$4 sm:$0xff]   ;;  %v2757_v41 = vld [vmem:[#allocation5 + $0x36c] ss:$24 sps:$4 sm:$0xff]  }
  0x4b   :  { %1844 = vmatpush2.bf16.msra.mxu0 %v2601_v48  ;;  %v2682_v48 = vld [vmem:[#allocation5 + $0x2dc] ss:$24 sps:$4 sm:$0xff]  }
  0x4c   :  { %1845 = vmatprep.subr.bf16.mxu0 %v2605_v50  ;;  %1887 = vmatpush2.bf16.msra.mxu1 %v2604_v51  ;;  %v2677_v50 = vld [vmem:[#allocation5 + $0x8d0] ss:$24 sps:$4 sm:$0xff]   ;;  %v2685_v51 = vld [vmem:[#allocation5 + $0x8a4] ss:$24 sps:$4 sm:$0xff]  }
  0x4d   :  { %1888 = vmatprep.subr.bf16.mxu1 %v2608_v54  ;;  %v2683_v54 = vld [vmem:[#allocation5 + $0x8a0] ss:$24 sps:$4 sm:$0xff]  }
  0x4f   :  { %1846 = vmatpush2.bf16.msra.mxu0 %v2607_v56  ;;  %v2691_v56 = vld [vmem:[#allocation5 + $0x874] ss:$24 sps:$4 sm:$0xff]  }
  0x50   :  { %1847 = vmatprep.subr.bf16.mxu0 %v2611_v57  ;;  %1889 = vmatpush2.bf16.msra.mxu1 %v2610_v58  ;;  %v2686_v57 = vld [vmem:[#allocation5 + $0x2a8] ss:$24 sps:$4 sm:$0xff]   ;;  %v2694_v58 = vld [vmem:[#allocation5 + $0x27c] ss:$24 sps:$4 sm:$0xff]  }
  0x51   :  { %1890 = vmatprep.subr.bf16.mxu1 %v2614_v59  ;;  %v2689_v59 = vld [vmem:[#allocation5 + $0x870] ss:$24 sps:$4 sm:$0xff]  }
  0x53   :  { %1848 = vmatpush2.bf16.msra.mxu0 %v2613_v60  ;;  %v2697_v60 = vld [vmem:[#allocation5 + $0x844] ss:$24 sps:$4 sm:$0xff]  }
  0x54   :  { %1849 = vmatprep.subr.bf16.mxu0 %v2617_v61  ;;  %1891 = vmatpush2.bf16.msra.mxu1 %v2616_v62  ;;  %v2692_v61 = vld [vmem:[#allocation5 + $0x278] ss:$24 sps:$4 sm:$0xff]   ;;  %v2700_v62 = vld [vmem:[#allocation5 + $0x24c] ss:$24 sps:$4 sm:$0xff]  }
  0x55   :  { %1892 = vmatprep.subr.bf16.mxu1 %v2620_v63  ;;  %v2695_v63 = vld [vmem:[#allocation5 + $0x840] ss:$24 sps:$4 sm:$0xff]  }
  0x57   :  { %1850 = vmatpush2.bf16.msra.mxu0 %v2619_v0  ;;  %v2703_v0 = vld [vmem:[#allocation5 + $0x814] ss:$24 sps:$4 sm:$0xff]  }
  0x58   :  { %1851 = vmatprep.subr.bf16.mxu0 %v2623_v2  ;;  %1893 = vmatpush2.bf16.msra.mxu1 %v2622_v1  ;;  %v2698_v1 = vld [vmem:[#allocation5 + $0x248] ss:$24 sps:$4 sm:$0xff]   ;;  %v2706_v2 = vld [vmem:[#allocation5 + $0x21c] ss:$24 sps:$4 sm:$0xff]  }
  0x59   :  { %1894 = vmatprep.subr.bf16.mxu1 %v2626_v4  ;;  %v2709_v4 = vld [vmem:[#allocation5 + $0x7e4] ss:$24 sps:$4 sm:$0xff]  }
  0x5b   :  { %1852 = vmatpush2.bf16.msra.mxu0 %v2625_v3  ;;  %v2701_v3 = vld [vmem:[#allocation5 + $0x810] ss:$24 sps:$4 sm:$0xff]  }
  0x5c   :  { %1907 = vmatprep.subr.bf16.mxu0 %v2631_v8  ;;  %1895 = vmatpush2.bf16.msra.mxu1 %v2628_v6  ;;  %v2712_v6 = vld [vmem:[#allocation5 + $0x1ec] ss:$24 sps:$4 sm:$0xff]  }
  0x5d   :  { %1950 = vmatprep.subr.bf16.mxu1 %v2634_v12  ;;  %v2715_v8 = vld [vmem:[#allocation5 + $0x7b4] ss:$24 sps:$4 sm:$0xff]   ;;  %v2713_v12 = vld [vmem:[#allocation5 + $0x7b0] ss:$24 sps:$4 sm:$0xff]  }
  0x5e   :  { %1854 = vmatmul.mubr.bf16.vlgmr.msra.gmra.mxu0 %v3073_v11 }
  0x5f   :  { %1908 = vmatpush1.bf16.msra.mxu0 %v2629_v13  ;;  %1897 = vmatmul.mubr.bf16.vlgmr.msra.gmra.mxu1 %v3075_v14  ;;  %v2721_v13 = vld [vmem:[#allocation5 + $0x784] ss:$24 sps:$4 sm:$0xff]  }
  0x60   :  { %1909 = vmatprep.subr.bf16.mxu0 %v2637_v15  ;;  %1951 = vmatpush1.bf16.msra.mxu1 %v2632_v16  ;;  %v2716_v15 = vld [vmem:[#allocation5 + $0x1b8] ss:$24 sps:$4 sm:$0xff]  }
  0x61   :  { %1982 = vmatprep.mubr.bf16.mxu1 %v3067_v49  ;;  %1952 = vmatprep.subr.bf16.mxu1 %v2640_v17  ;;  %v2719_v16 = vld [vmem:[#allocation5 + $0x780] ss:$24 sps:$4 sm:$0xff]   ;;  %v2724_v17 = vld [vmem:[#allocation5 + $0x18c] ss:$24 sps:$4 sm:$0xff]  }
  0x62   :  { %1939 = vmatprep.mubr.bf16.mxu0 %v3080_v43 }
  0x63   :  { %1910 = vmatpush1.bf16.msra.mxu0 %v2635_v18  ;;  %v47_v18 = vld [vmem:[#allocation2 + $0x20] sm:$0xff] }
  0x64   :  { %1911 = vmatprep.subr.bf16.mxu0 %v2643_v19  ;;  %1953 = vmatpush1.bf16.msra.mxu1 %v2638_v20  ;;  %v53_v19 = vld [vmem:[#allocation2 + $0x50] sm:$0xff] }
  0x65   :  { %1954 = vmatprep.subr.bf16.mxu1 %v2646_v21  ;;  %v2727_v20 = vld [vmem:[#allocation5 + $0x45c] ss:$24 sps:$4 sm:$0xff]   ;;  %v2722_v21 = vld [vmem:[#allocation5 + $0x188] ss:$24 sps:$4 sm:$0xff]  }
  0x67   :  { %1912 = vmatpush1.bf16.msra.mxu0 %v2641_v22  ;;  %v3083_v22 = vpack.c.bf16 %v53_v19, %v47_v18  ;;  %v2811_v18 = vld [vmem:[#allocation5 + $0x4bc] ss:$24 sps:$4 sm:$0xff]   ;;  %v2806_v19 = vld [vmem:[#allocation5 + $0x7e8] ss:$24 sps:$4 sm:$0xff]  }
  0x68   :  { %1913 = vmatprep.subr.bf16.mxu0 %v2649_v23  ;;  %1955 = vmatpush1.bf16.msra.mxu1 %v2644_v24  ;;  %v2730_v23 = vld [vmem:[#allocation5 + $0x75c] ss:$24 sps:$4 sm:$0xff]   ;;  %v2725_v24 = vld [vmem:[#allocation5 + $0x458] ss:$24 sps:$4 sm:$0xff]  }
  0x69   :  { %1956 = vmatprep.subr.bf16.mxu1 %v2652_v25  ;;  %v2733_v25 = vld [vmem:[#allocation5 + $0x42c] ss:$24 sps:$4 sm:$0xff]  }
  0x6b   :  { %1914 = vmatpush1.bf16.msra.mxu0 %v2647_v26  ;;  %v2728_v26 = vld [vmem:[#allocation5 + $0x758] ss:$24 sps:$4 sm:$0xff]  }
  0x6c   :  { %1915 = vmatprep.subr.bf16.mxu0 %v2655_v27  ;;  %1957 = vmatpush1.bf16.msra.mxu1 %v2650_v28  ;;  %v2736_v27 = vld [vmem:[#allocation5 + $0x72c] ss:$24 sps:$4 sm:$0xff]   ;;  %v2731_v28 = vld [vmem:[#allocation5 + $0x428] ss:$24 sps:$4 sm:$0xff]  }
  0x6d   :  { %1958 = vmatprep.subr.bf16.mxu1 %v2658_v29  ;;  %v2739_v29 = vld [vmem:[#allocation5 + $0x3fc] ss:$24 sps:$4 sm:$0xff]  }
  0x6f   :  { %1916 = vmatpush1.bf16.msra.mxu0 %v2653_v30  ;;  %v2734_v30 = vld [vmem:[#allocation5 + $0x728] ss:$24 sps:$4 sm:$0xff]  }
  0x70   :  { %1917 = vmatprep.subr.bf16.mxu0 %v2661_v31  ;;  %1959 = vmatpush1.bf16.msra.mxu1 %v2656_v32  ;;  %v2742_v31 = vld [vmem:[#allocation5 + $0x6fc] ss:$24 sps:$4 sm:$0xff]   ;;  %v2737_v32 = vld [vmem:[#allocation5 + $0x3f8] ss:$24 sps:$4 sm:$0xff]  }
  0x71   :  { %1960 = vmatprep.subr.bf16.mxu1 %v2664_v33  ;;  %v2745_v33 = vld [vmem:[#allocation5 + $0x3cc] ss:$24 sps:$4 sm:$0xff]  }
  0x73   :  { %1918 = vmatpush1.bf16.msra.mxu0 %v2659_v34  ;;  %v2740_v34 = vld [vmem:[#allocation5 + $0x6f8] ss:$24 sps:$4 sm:$0xff]  }
  0x74   :  { %1919 = vmatprep.subr.bf16.mxu0 %v2667_v35  ;;  %1961 = vmatpush1.bf16.msra.mxu1 %v2662_v36  ;;  %v2748_v35 = vld [vmem:[#allocation5 + $0x6cc] ss:$24 sps:$4 sm:$0xff]   ;;  %v2743_v36 = vld [vmem:[#allocation5 + $0x3c8] ss:$24 sps:$4 sm:$0xff]  }
  0x75   :  { %1962 = vmatprep.subr.bf16.mxu1 %v2670_v37  ;;  %v2751_v37 = vld [vmem:[#allocation5 + $0x39c] ss:$24 sps:$4 sm:$0xff]  }
  0x77   :  { %1920 = vmatpush1.bf16.msra.mxu0 %v2665_v38  ;;  %v2746_v38 = vld [vmem:[#allocation5 + $0x6c8] ss:$24 sps:$4 sm:$0xff]  }
  0x78   :  { %1921 = vmatprep.subr.bf16.mxu0 %v2673_v39  ;;  %1963 = vmatpush1.bf16.msra.mxu1 %v2668_v42  ;;  %v2754_v39 = vld [vmem:[#allocation5 + $0x69c] ss:$24 sps:$4 sm:$0xff]   ;;  %v2752_v42 = vld [vmem:[#allocation5 + $0x698] ss:$24 sps:$4 sm:$0xff]  }
  0x79   :  { %1964 = vmatprep.subr.bf16.mxu1 %v2676_v44  ;;  %v2760_v44 = vld [vmem:[#allocation5 + $0x66c] ss:$24 sps:$4 sm:$0xff]  }
  0x7b   :  { %1922 = vmatpush1.bf16.msra.mxu0 %v2671_v45  ;;  %v2755_v45 = vld [vmem:[#allocation5 + $0x368] ss:$24 sps:$4 sm:$0xff]  }
  0x7c   :  { %1923 = vmatprep.subr.bf16.mxu0 %v2679_v46  ;;  %1965 = vmatpush1.bf16.msra.mxu1 %v2674_v47  ;;  %v2763_v46 = vld [vmem:[#allocation5 + $0x33c] ss:$24 sps:$4 sm:$0xff]   ;;  %v2758_v47 = vld [vmem:[#allocation5 + $0x668] ss:$24 sps:$4 sm:$0xff]  }
  0x7d   :  { %1966 = vmatprep.subr.bf16.mxu1 %v2682_v48  ;;  %v2766_v48 = vld [vmem:[#allocation5 + $0x63c] ss:$24 sps:$4 sm:$0xff]  }
  0x7f   :  { %1924 = vmatpush2.bf16.msra.mxu0 %v2677_v50  ;;  %v2761_v50 = vld [vmem:[#allocation5 + $0x338] ss:$24 sps:$4 sm:$0xff]  }
  0x80   :  { %1925 = vmatprep.subr.bf16.mxu0 %v2685_v51  ;;  %1967 = vmatpush2.bf16.msra.mxu1 %v2680_v52  ;;  %v2769_v51 = vld [vmem:[#allocation5 + $0x30c] ss:$24 sps:$4 sm:$0xff]   ;;  %v2764_v52 = vld [vmem:[#allocation5 + $0x638] ss:$24 sps:$4 sm:$0xff]  }
  0x81   :  { %1968 = vmatprep.subr.bf16.mxu1 %v2688_v53  ;;  %v2772_v53 = vld [vmem:[#allocation5 + $0x60c] ss:$24 sps:$4 sm:$0xff]  }
  0x83   :  { %1926 = vmatpush2.bf16.msra.mxu0 %v2683_v54  ;;  %v2767_v54 = vld [vmem:[#allocation5 + $0x308] ss:$24 sps:$4 sm:$0xff]  }
  0x84   :  { %1927 = vmatprep.subr.bf16.mxu0 %v2691_v56  ;;  %1969 = vmatpush2.bf16.msra.mxu1 %v2686_v57  ;;  %v2775_v56 = vld [vmem:[#allocation5 + $0x5dc] ss:$24 sps:$4 sm:$0xff]   ;;  %v2770_v57 = vld [vmem:[#allocation5 + $0x608] ss:$24 sps:$4 sm:$0xff]  }
  0x85   :  { %1970 = vmatprep.subr.bf16.mxu1 %v2694_v58  ;;  %v2778_v58 = vld [vmem:[#allocation5 + $0x8dc] ss:$24 sps:$4 sm:$0xff]  }
  0x87   :  { %1928 = vmatpush2.bf16.msra.mxu0 %v2689_v59  ;;  %v2773_v59 = vld [vmem:[#allocation5 + $0x5d8] ss:$24 sps:$4 sm:$0xff]  }
  0x88   :  { %1929 = vmatprep.subr.bf16.mxu0 %v2697_v60  ;;  %1971 = vmatpush2.bf16.msra.mxu1 %v2692_v61  ;;  %v2781_v60 = vld [vmem:[#allocation5 + $0x5ac] ss:$24 sps:$4 sm:$0xff]   ;;  %v2776_v61 = vld [vmem:[#allocation5 + $0x8d8] ss:$24 sps:$4 sm:$0xff]  }
  0x89   :  { %1972 = vmatprep.subr.bf16.mxu1 %v2700_v62  ;;  %v2784_v62 = vld [vmem:[#allocation5 + $0x8ac] ss:$24 sps:$4 sm:$0xff]  }
  0x8b   :  { %1930 = vmatpush2.bf16.msra.mxu0 %v2695_v63  ;;  %v2779_v63 = vld [vmem:[#allocation5 + $0x5a8] ss:$24 sps:$4 sm:$0xff]  }
  0x8c   :  { %1931 = vmatprep.subr.bf16.mxu0 %v2703_v0  ;;  %1973 = vmatpush2.bf16.msra.mxu1 %v2698_v1  ;;  %v2787_v0 = vld [vmem:[#allocation5 + $0x57c] ss:$24 sps:$4 sm:$0xff]   ;;  %v2782_v1 = vld [vmem:[#allocation5 + $0x8a8] ss:$24 sps:$4 sm:$0xff]  }
  0x8d   :  { %1974 = vmatprep.subr.bf16.mxu1 %v2706_v2  ;;  %v2790_v2 = vld [vmem:[#allocation5 + $0x87c] ss:$24 sps:$4 sm:$0xff]  }
  0x8f   :  { %1932 = vmatpush2.bf16.msra.mxu0 %v2701_v3  ;;  %v2785_v3 = vld [vmem:[#allocation5 + $0x578] ss:$24 sps:$4 sm:$0xff]  }
  0x90   :  { %1933 = vmatprep.subr.bf16.mxu0 %v2709_v4  ;;  %1975 = vmatpush2.bf16.msra.mxu1 %v2704_v5  ;;  %v2793_v4 = vld [vmem:[#allocation5 + $0x54c] ss:$24 sps:$4 sm:$0xff]   ;;  %v2788_v5 = vld [vmem:[#allocation5 + $0x878] ss:$24 sps:$4 sm:$0xff]  }
  0x91   :  { %1976 = vmatprep.subr.bf16.mxu1 %v2712_v6  ;;  %v2796_v6 = vld [vmem:[#allocation5 + $0x84c] ss:$24 sps:$4 sm:$0xff]  }
  0x93   :  { %1934 = vmatpush2.bf16.msra.mxu0 %v2707_v7  ;;  %v2791_v7 = vld [vmem:[#allocation5 + $0x548] ss:$24 sps:$4 sm:$0xff]  }
  0x94   :  { %1935 = vmatprep.subr.bf16.mxu0 %v2715_v8  ;;  %1977 = vmatpush2.bf16.msra.mxu1 %v2710_v9  ;;  %v2799_v8 = vld [vmem:[#allocation5 + $0x51c] ss:$24 sps:$4 sm:$0xff]   ;;  %v2794_v9 = vld [vmem:[#allocation5 + $0x848] ss:$24 sps:$4 sm:$0xff]  }
  0x95   :  { %1978 = vmatprep.subr.bf16.mxu1 %v2718_v10  ;;  %v2802_v10 = vld [vmem:[#allocation5 + $0x81c] ss:$24 sps:$4 sm:$0xff]  }
  0x97   :  { %1936 = vmatpush2.bf16.msra.mxu0 %v2713_v12  ;;  %v2797_v12 = vld [vmem:[#allocation5 + $0x518] ss:$24 sps:$4 sm:$0xff]  }
  0x98   :  { %1937 = vmatprep.subr.bf16.mxu0 %v2721_v13  ;;  %1979 = vmatpush2.bf16.msra.mxu1 %v2716_v15  ;;  %v2805_v13 = vld [vmem:[#allocation5 + $0x4ec] ss:$24 sps:$4 sm:$0xff]   ;;  %v2800_v15 = vld [vmem:[#allocation5 + $0x818] ss:$24 sps:$4 sm:$0xff]  }
  0x99   :  { %1980 = vmatprep.subr.bf16.mxu1 %v2724_v17  ;;  %v2803_v17 = vld [vmem:[#allocation5 + $0x4e8] ss:$24 sps:$4 sm:$0xff]  }
  0x9b   :  { %1938 = vmatpush2.bf16.msra.mxu0 %v2719_v16  ;;  %v2808_v16 = vld [vmem:[#allocation5 + $0x7ec] ss:$24 sps:$4 sm:$0xff]  }
  0x9c   :  { %1993 = vmatprep.subr.bf16.mxu0 %v2727_v20  ;;  %1981 = vmatpush2.bf16.msra.mxu1 %v2722_v21  ;;  %v2814_v20 = vld [vmem:[#allocation5 + $0x7bc] ss:$24 sps:$4 sm:$0xff]   ;;  %v2809_v21 = vld [vmem:[#allocation5 + $0x4b8] ss:$24 sps:$4 sm:$0xff]  }
  0x9d   :  { %2036 = vmatprep.subr.bf16.mxu1 %v2730_v23  ;;  %v2817_v23 = vld [vmem:[#allocation5 + $0x48c] ss:$24 sps:$4 sm:$0xff]  }
  0x9e   :  { %1940 = vmatmul.mubr.bf16.vlgmr.msra.gmra.mxu0 %v3083_v22 }
  0x9f   :  { %1994 = vmatpush1.bf16.msra.mxu0 %v2725_v24  ;;  %2025 = vmatprep.mubr.bf16.mxu0 %v3070_v55  ;;  %v2812_v24 = vld [vmem:[#allocation5 + $0x7b8] ss:$24 sps:$4 sm:$0xff]  }
  0xa0   :  { %1983 = vmatmul.mubr.bf16.vlgmr.msra.gmra.mxu1 %v3073_v11  ;;  %1995 = vmatprep.subr.bf16.mxu0 %v2733_v25  ;;  %v2820_v25 = vld [vmem:[#allocation5 + $0x78c] ss:$24 sps:$4 sm:$0xff]  }
  0xa1   :  { %2037 = vmatpush1.bf16.msra.mxu1 %v2728_v26  ;;  %2068 = vmatprep.mubr.bf16.mxu1 %v3080_v43  ;;  %v2815_v26 = vld [vmem:[#allocation5 + $0x488] ss:$24 sps:$4 sm:$0xff]  }
  0xa2   :  { %2038 = vmatprep.subr.bf16.mxu1 %v2736_v27  ;;  %v2823_v27 = vld [vmem:[#allocation5 + $0x164] ss:$24 sps:$4 sm:$0xff]  }
  0xa3   :  { %1996 = vmatpush1.bf16.msra.mxu0 %v2731_v28  ;;  %v2818_v28 = vld [vmem:[#allocation5 + $0x788] ss:$24 sps:$4 sm:$0xff]  }
  0xa4   :  { %1997 = vmatprep.subr.bf16.mxu0 %v2739_v29  ;;  %v2826_v29 = vld [vmem:[#allocation5 + $0x464] ss:$24 sps:$4 sm:$0xff]  }
  0xa5   :  { %2039 = vmatpush1.bf16.msra.mxu1 %v2734_v30  ;;  %v2821_v30 = vld [vmem:[#allocation5 + $0x160] ss:$24 sps:$4 sm:$0xff]  }
  0xa6   :  { %2040 = vmatprep.subr.bf16.mxu1 %v2742_v31  ;;  %v2829_v31 = vld [vmem:[#allocation5 + $0x134] ss:$24 sps:$4 sm:$0xff]  }
  0xa7   :  { %1998 = vmatpush1.bf16.msra.mxu0 %v2737_v32  ;;  %v2824_v32 = vld [vmem:[#allocation5 + $0x460] ss:$24 sps:$4 sm:$0xff]  }
  0xa8   :  { %1999 = vmatprep.subr.bf16.mxu0 %v2745_v33  ;;  %v2832_v33 = vld [vmem:[#allocation5 + $0x434] ss:$24 sps:$4 sm:$0xff]  }
  0xa9   :  { %2041 = vmatpush1.bf16.msra.mxu1 %v2740_v34  ;;  %v2827_v34 = vld [vmem:[#allocation5 + $0x130] ss:$24 sps:$4 sm:$0xff]  }
  0xaa   :  { %2042 = vmatprep.subr.bf16.mxu1 %v2748_v35  ;;  %v2835_v35 = vld [vmem:[#allocation5 + $0x104] ss:$24 sps:$4 sm:$0xff]  }
  0xab   :  { %2000 = vmatpush1.bf16.msra.mxu0 %v2743_v36  ;;  %v2830_v36 = vld [vmem:[#allocation5 + $0x430] ss:$24 sps:$4 sm:$0xff]  }
  0xac   :  { %2001 = vmatprep.subr.bf16.mxu0 %v2751_v37  ;;  %v2838_v37 = vld [vmem:[#allocation5 + $0x404] ss:$24 sps:$4 sm:$0xff]  }
  0xad   :  { %2043 = vmatpush1.bf16.msra.mxu1 %v2746_v38  ;;  %v2833_v38 = vld [vmem:[#allocation5 + $0x100] ss:$24 sps:$4 sm:$0xff]  }
  0xae   :  { %2044 = vmatprep.subr.bf16.mxu1 %v2754_v39  ;;  %v2841_v39 = vld [vmem:[#allocation5 + $0xd4] ss:$24 sps:$4 sm:$0xff]  }
  0xaf   :  { %2002 = vmatpush1.bf16.msra.mxu0 %v2749_v40  ;;  %v2836_v40 = vld [vmem:[#allocation5 + $0x400] ss:$24 sps:$4 sm:$0xff]  }
  0xb0   :  { %2003 = vmatprep.subr.bf16.mxu0 %v2757_v41  ;;  %v2844_v41 = vld [vmem:[#allocation5 + $0x3d4] ss:$24 sps:$4 sm:$0xff]  }
  0xb1   :  { %2045 = vmatpush1.bf16.msra.mxu1 %v2752_v42  ;;  %v2847_v42 = vld [vmem:[#allocation5 + $0xa4] ss:$24 sps:$4 sm:$0xff]  }
  0xb2   :  { %2046 = vmatprep.subr.bf16.mxu1 %v2760_v44  ;;  %v2842_v44 = vld [vmem:[#allocation5 + $0x3d0] ss:$24 sps:$4 sm:$0xff]  }
  0xb3   :  { %2004 = vmatpush1.bf16.msra.mxu0 %v2755_v45  ;;  %v2850_v45 = vld [vmem:[#allocation5 + $0x3a4] ss:$24 sps:$4 sm:$0xff]  }
  0xb4   :  { %2005 = vmatprep.subr.bf16.mxu0 %v2763_v46  ;;  %v2853_v46 = vld [vmem:[#allocation5 + $0x74] ss:$24 sps:$4 sm:$0xff]  }
  0xb5   :  { %2047 = vmatpush1.bf16.msra.mxu1 %v2758_v47  ;;  %v2848_v47 = vld [vmem:[#allocation5 + $0x3a0] ss:$24 sps:$4 sm:$0xff]  }
  0xb6   :  { %2048 = vmatprep.subr.bf16.mxu1 %v2766_v48  ;;  %v2856_v48 = vld [vmem:[#allocation5 + $0x374] ss:$24 sps:$4 sm:$0xff]  }
  0xb7   :  { %2006 = vmatpush1.bf16.msra.mxu0 %v2761_v50  ;;  %v2851_v50 = vld [vmem:[#allocation5 + $0x70] ss:$24 sps:$4 sm:$0xff]  }
  0xb8   :  { %2007 = vmatprep.subr.bf16.mxu0 %v2769_v51  ;;  %v2859_v51 = vld [vmem:[#allocation5 + $0x44] ss:$24 sps:$4 sm:$0xff]  }
  0xb9   :  { %2049 = vmatpush1.bf16.msra.mxu1 %v2764_v52  ;;  %v2854_v52 = vld [vmem:[#allocation5 + $0x370] ss:$24 sps:$4 sm:$0xff]  }
  0xba   :  { %2050 = vmatprep.subr.bf16.mxu1 %v2772_v53  ;;  %v2862_v53 = vld [vmem:[#allocation5 + $0x344] ss:$24 sps:$4 sm:$0xff]  }
  0xbb   :  { %2008 = vmatpush1.bf16.msra.mxu0 %v2767_v54  ;;  %v2857_v54 = vld [vmem:[#allocation5 + $0x40] ss:$24 sps:$4 sm:$0xff]  }
  0xbc   :  { %2009 = vmatprep.subr.bf16.mxu0 %v2775_v56  ;;  %v2865_v56 = vld [vmem:[#allocation5 + $0x14] ss:$24 sps:$4 sm:$0xff]  }
  0xbd   :  { %2051 = vmatpush1.bf16.msra.mxu1 %v2770_v57  ;;  %v2860_v57 = vld [vmem:[#allocation5 + $0x340] ss:$24 sps:$4 sm:$0xff]  }
  0xbe   :  { %2052 = vmatprep.subr.bf16.mxu1 %v2778_v58  ;;  %v2868_v58 = vld [vmem:[#allocation5 + $0x314] ss:$24 sps:$4 sm:$0xff]  }
  0xbf   :  { %2010 = vmatpush2.bf16.msra.mxu0 %v2773_v59  ;;  %v2863_v59 = vld [vmem:[#allocation5 + $0x10] ss:$24 sps:$4 sm:$0xff]  }
  0xc0   :  { %2011 = vmatprep.subr.bf16.mxu0 %v2781_v60  ;;  %v2871_v60 = vld [vmem:[#allocation5 + $0x2e4] ss:$24 sps:$4 sm:$0xff]  }
  0xc1   :  { %2053 = vmatpush2.bf16.msra.mxu1 %v2776_v61  ;;  %v2866_v61 = vld [vmem:[#allocation5 + $0x310] ss:$24 sps:$4 sm:$0xff]  }
  0xc2   :  { %2054 = vmatprep.subr.bf16.mxu1 %v2784_v62  ;;  %v2874_v62 = vld [vmem:[#allocation5 + $0x5e4] ss:$24 sps:$4 sm:$0xff]  }
  0xc3   :  { %2012 = vmatpush2.bf16.msra.mxu0 %v2779_v63  ;;  %v2869_v63 = vld [vmem:[#allocation5 + $0x2e0] ss:$24 sps:$4 sm:$0xff]  }
  0xc4   :  { %2013 = vmatprep.subr.bf16.mxu0 %v2787_v0  ;;  %v2877_v0 = vld [vmem:[#allocation5 + $0x2b4] ss:$24 sps:$4 sm:$0xff]  }
  0xc5   :  { %2055 = vmatpush2.bf16.msra.mxu1 %v2782_v1  ;;  %v2872_v1 = vld [vmem:[#allocation5 + $0x5e0] ss:$24 sps:$4 sm:$0xff]  }
  0xc6   :  { %2056 = vmatprep.subr.bf16.mxu1 %v2790_v2  ;;  %v2880_v2 = vld [vmem:[#allocation5 + $0x5b4] ss:$24 sps:$4 sm:$0xff]  }
  0xc7   :  { %2014 = vmatpush2.bf16.msra.mxu0 %v2785_v3  ;;  %v2875_v3 = vld [vmem:[#allocation5 + $0x2b0] ss:$24 sps:$4 sm:$0xff]  }
  0xc8   :  { %2015 = vmatprep.subr.bf16.mxu0 %v2793_v4  ;;  %v2883_v4 = vld [vmem:[#allocation5 + $0x284] ss:$24 sps:$4 sm:$0xff]  }
  0xc9   :  { %2057 = vmatpush2.bf16.msra.mxu1 %v2788_v5  ;;  %v2878_v5 = vld [vmem:[#allocation5 + $0x5b0] ss:$24 sps:$4 sm:$0xff]  }
  0xca   :  { %2058 = vmatprep.subr.bf16.mxu1 %v2796_v6  ;;  %v2886_v6 = vld [vmem:[#allocation5 + $0x584] ss:$24 sps:$4 sm:$0xff]  }
  0xcb   :  { %2016 = vmatpush2.bf16.msra.mxu0 %v2791_v7  ;;  %v2881_v7 = vld [vmem:[#allocation5 + $0x280] ss:$24 sps:$4 sm:$0xff]  }
  0xcc   :  { %2017 = vmatprep.subr.bf16.mxu0 %v2799_v8  ;;  %v2889_v8 = vld [vmem:[#allocation5 + $0x254] ss:$24 sps:$4 sm:$0xff]  }
  0xcd   :  { %2059 = vmatpush2.bf16.msra.mxu1 %v2794_v9  ;;  %v2884_v9 = vld [vmem:[#allocation5 + $0x580] ss:$24 sps:$4 sm:$0xff]  }
  0xce   :  { %2060 = vmatprep.subr.bf16.mxu1 %v2802_v10  ;;  %v2892_v10 = vld [vmem:[#allocation5 + $0x554] ss:$24 sps:$4 sm:$0xff]  }
  0xcf   :  { %2018 = vmatpush2.bf16.msra.mxu0 %v2797_v12  ;;  %v2887_v12 = vld [vmem:[#allocation5 + $0x250] ss:$24 sps:$4 sm:$0xff]  }
  0xd0   :  { %2019 = vmatprep.subr.bf16.mxu0 %v2805_v13  ;;  %v2895_v13 = vld [vmem:[#allocation5 + $0x224] ss:$24 sps:$4 sm:$0xff]  }
  0xd1   :  { %2061 = vmatpush2.bf16.msra.mxu1 %v2800_v15  ;;  %v2890_v15 = vld [vmem:[#allocation5 + $0x550] ss:$24 sps:$4 sm:$0xff]  }
  0xd2   :  { %2062 = vmatprep.subr.bf16.mxu1 %v2808_v16  ;;  %v2898_v16 = vld [vmem:[#allocation5 + $0x524] ss:$24 sps:$4 sm:$0xff]  }
  0xd3   :  { %2020 = vmatpush2.bf16.msra.mxu0 %v2803_v17  ;;  %v2893_v17 = vld [vmem:[#allocation5 + $0x220] ss:$24 sps:$4 sm:$0xff]  }
  0xd4   :  { %2021 = vmatprep.subr.bf16.mxu0 %v2811_v18  ;;  %v2901_v18 = vld [vmem:[#allocation5 + $0x1f4] ss:$24 sps:$4 sm:$0xff]  }
  0xd5   :  { %2063 = vmatpush2.bf16.msra.mxu1 %v2806_v19  ;;  %v2896_v19 = vld [vmem:[#allocation5 + $0x520] ss:$24 sps:$4 sm:$0xff]  }
  0xd6   :  { %2064 = vmatprep.subr.bf16.mxu1 %v2814_v20  ;;  %v2904_v20 = vld [vmem:[#allocation5 + $0x4f4] ss:$24 sps:$4 sm:$0xff]  }
  0xd7   :  { %2022 = vmatpush2.bf16.msra.mxu0 %v2809_v21  ;;  %v2899_v21 = vld [vmem:[#allocation5 + $0x1f0] ss:$24 sps:$4 sm:$0xff]  }
  0xd8   :  { %2023 = vmatprep.subr.bf16.mxu0 %v2817_v23  ;;  %v2907_v23 = vld [vmem:[#allocation5 + $0x1c4] ss:$24 sps:$4 sm:$0xff]  }
  0xd9   :  { %2065 = vmatpush2.bf16.msra.mxu1 %v2812_v24  ;;  %v2902_v24 = vld [vmem:[#allocation5 + $0x4f0] ss:$24 sps:$4 sm:$0xff]  }
  0xda   :  { %2066 = vmatprep.subr.bf16.mxu1 %v2820_v25  ;;  %v2910_v25 = vld [vmem:[#allocation5 + $0x4c4] ss:$24 sps:$4 sm:$0xff]  }
  0xdb   :  { %2024 = vmatpush2.bf16.msra.mxu0 %v2815_v26  ;;  %v2905_v26 = vld [vmem:[#allocation5 + $0x1c0] ss:$24 sps:$4 sm:$0xff]  }
  0xdc   :  { %2079 = vmatprep.subr.bf16.mxu0 %v2823_v27  ;;  %v2913_v27 = vld [vmem:[#allocation5 + $0x194] ss:$24 sps:$4 sm:$0xff]  }
  0xdd   :  { %2067 = vmatpush2.bf16.msra.mxu1 %v2818_v28  ;;  %v2908_v28 = vld [vmem:[#allocation5 + $0x4c0] ss:$24 sps:$4 sm:$0xff]  }
  0xde   :  { %2026 = vmatmul.mubr.bf16.vlgmr.msra.gmra.mxu0 %v3075_v14  ;;  %2122 = vmatprep.subr.bf16.mxu1 %v2826_v29  ;;  %v2916_v29 = vld [vmem:[#allocation5 + $0x494] ss:$24 sps:$4 sm:$0xff]  }
  0xdf   :  { %2080 = vmatpush1.bf16.msra.mxu0 %v2821_v30  ;;  %2111 = vmatprep.mubr.bf16.mxu0 %v3067_v49  ;;  %v2839_v49 = vld [vmem:[#allocation5 + $0xd0] ss:$24 sps:$4 sm:$0xff]  }
  0xe0   :  { %2069 = vmatmul.mubr.bf16.vlgmr.msra.gmra.mxu1 %v3083_v22  ;;  %2081 = vmatprep.subr.bf16.mxu0 %v2829_v31  ;;  %v2911_v30 = vld [vmem:[#allocation5 + $0x190] ss:$24 sps:$4 sm:$0xff]   ;;  %v2919_v31 = vld [vmem:[#allocation5 + $0x764] ss:$24 sps:$4 sm:$0xff]  }
  0xe1   :  { %2123 = vmatpush1.bf16.msra.mxu1 %v2824_v32  ;;  %2154 = vmatprep.mubr.bf16.mxu1 %v3070_v55  ;;  %v2845_v55 = vld [vmem:[#allocation5 + $0xa0] ss:$24 sps:$4 sm:$0xff]   ;;  %v2914_v32 = vld [vmem:[#allocation5 + $0x490] ss:$24 sps:$4 sm:$0xff]  }
  0xe2   :  { %2124 = vmatprep.subr.bf16.mxu1 %v2832_v33  ;;  %v2917_v33 = vld [vmem:[#allocation5 + $0x760] ss:$24 sps:$4 sm:$0xff]  }
  0xe3   :  { %2082 = vmatpush1.bf16.msra.mxu0 %v2827_v34  ;;  %v2922_v34 = vld [vmem:[#allocation5 + $0x734] ss:$24 sps:$4 sm:$0xff]  }
  0xe4   :  { %2083 = vmatprep.subr.bf16.mxu0 %v2835_v35  ;;  %v2920_v35 = vld [vmem:[#allocation5 + $0x730] ss:$24 sps:$4 sm:$0xff]  }
  0xe5   :  { %2125 = vmatpush1.bf16.msra.mxu1 %v2830_v36  ;;  %v2925_v36 = vld [vmem:[#allocation5 + $0x704] ss:$24 sps:$4 sm:$0xff]  }
  0xe6   :  { %2126 = vmatprep.subr.bf16.mxu1 %v2838_v37  ;;  %v2923_v37 = vld [vmem:[#allocation5 + $0x700] ss:$24 sps:$4 sm:$0xff]  }
  0xe7   :  { %2084 = vmatpush1.bf16.msra.mxu0 %v2833_v38  ;;  %v2928_v38 = vld [vmem:[#allocation5 + $0x6d4] ss:$24 sps:$4 sm:$0xff]  }
  0xe8   :  { %2085 = vmatprep.subr.bf16.mxu0 %v2841_v39  ;;  %v2926_v39 = vld [vmem:[#allocation5 + $0x6d0] ss:$24 sps:$4 sm:$0xff]  }
  0xe9   :  { %2127 = vmatpush1.bf16.msra.mxu1 %v2836_v40  ;;  %v2931_v40 = vld [vmem:[#allocation5 + $0x6a4] ss:$24 sps:$4 sm:$0xff]  }
  0xea   :  { %2128 = vmatprep.subr.bf16.mxu1 %v2844_v41  ;;  %v2929_v41 = vld [vmem:[#allocation5 + $0x6a0] ss:$24 sps:$4 sm:$0xff]  }
  0xeb   :  { %2086 = vmatpush1.bf16.msra.mxu0 %v2839_v49  ;;  %v2932_v49 = vld [vmem:[#allocation5 + $0x670] ss:$24 sps:$4 sm:$0xff]  }
  0xec   :  { %2087 = vmatprep.subr.bf16.mxu0 %v2847_v42  ;;  %v2940_v42 = vld [vmem:[#allocation5 + $0x614] ss:$24 sps:$4 sm:$0xff]  }
  0xed   :  { %2129 = vmatpush1.bf16.msra.mxu1 %v2842_v44  ;;  %v2938_v44 = vld [vmem:[#allocation5 + $0x610] ss:$24 sps:$4 sm:$0xff]  }
  0xee   :  { %2130 = vmatprep.subr.bf16.mxu1 %v2850_v45  ;;  %v2943_v45 = vld [vmem:[#allocation5 + $0x8e4] ss:$24 sps:$4 sm:$0xff]  }
  0xef   :  { %2088 = vmatpush1.bf16.msra.mxu0 %v2845_v55  ;;  %v2941_v55 = vld [vmem:[#allocation5 + $0x8e0] ss:$24 sps:$4 sm:$0xff]  }
  0xf0   :  { %2089 = vmatprep.subr.bf16.mxu0 %v2853_v46  ;;  %v2946_v46 = vld [vmem:[#allocation5 + $0x8b4] ss:$24 sps:$4 sm:$0xff]  }
  0xf1   :  { %2131 = vmatpush1.bf16.msra.mxu1 %v2848_v47  ;;  %v2944_v47 = vld [vmem:[#allocation5 + $0x8b0] ss:$24 sps:$4 sm:$0xff]  }
  0xf2   :  { %2132 = vmatprep.subr.bf16.mxu1 %v2856_v48  ;;  %v2949_v48 = vld [vmem:[#allocation5 + $0x884] ss:$24 sps:$4 sm:$0xff]  }
  0xf3   :  { %2090 = vmatpush1.bf16.msra.mxu0 %v2851_v50  ;;  %v2947_v50 = vld [vmem:[#allocation5 + $0x880] ss:$24 sps:$4 sm:$0xff]  }
  0xf4   :  { %2091 = vmatprep.subr.bf16.mxu0 %v2859_v51  ;;  %v2952_v51 = vld [vmem:[#allocation5 + $0x854] ss:$24 sps:$4 sm:$0xff]  }
  0xf5   :  { %2133 = vmatpush1.bf16.msra.mxu1 %v2854_v52  ;;  %v2950_v52 = vld [vmem:[#allocation5 + $0x850] ss:$24 sps:$4 sm:$0xff]  }
  0xf6   :  { %2134 = vmatprep.subr.bf16.mxu1 %v2862_v53  ;;  %v2955_v53 = vld [vmem:[#allocation5 + $0x824] ss:$24 sps:$4 sm:$0xff]  }
  0xf7   :  { %2092 = vmatpush1.bf16.msra.mxu0 %v2857_v54  ;;  %v351_v54 = vlaneseq }
  0xf8   :  { %2093 = vmatprep.subr.bf16.mxu0 %v2865_v56  ;;  %v2953_v56 = vld [vmem:[#allocation5 + $0x820] ss:$24 sps:$4 sm:$0xff]  }
  0xf9   :  { %2135 = vmatpush1.bf16.msra.mxu1 %v2860_v57  ;;  %v2958_v57 = vld [vmem:[#allocation5 + $0x7f4] ss:$24 sps:$4 sm:$0xff]  }
  0xfa   :  { %2136 = vmatprep.subr.bf16.mxu1 %v2868_v58  ;;  %v3096_v58 = vshrl.u32 %v351_v54, 7 }
  0xfb   :  { %2094 = vmatpush1.bf16.msra.mxu0 %v2863_v59  ;;  %v2956_v59 = vld [vmem:[#allocation5 + $0x7f0] ss:$24 sps:$4 sm:$0xff]  }
  0xfc   :  { %2095 = vmatprep.subr.bf16.mxu0 %v2871_v60 }
  0xfd   :  { %2137 = vmatpush1.bf16.msra.mxu1 %v2866_v61  ;;  %v2961_v61 = vld [vmem:[#allocation5 + $0x7c4] ss:$24 sps:$4 sm:$0xff]  }
  0xfe   :  { %2138 = vmatprep.subr.bf16.mxu1 %v2874_v62  ;;  %v353_v62 = vsub.s32 0, %v3096_v58 }
  0xff   :  { %2096 = vmatpush2.bf16.msra.mxu0 %v2869_v63  ;;  %v3102_v63 = vld [vmem:[%s3124_s2] sm:$0x3f]  ;;  %s3037_s2 = smov [#allocation7]  }
 0x100   :  { %2097 = vmatprep.subr.bf16.mxu0 %v2877_v0  ;;  %v357_v0 = vsub.s32 1, %v3096_v58  ;;  %s2225_s26 = sshll.u32 %s3037_s2, 4  ;;  %s2226_s26 = int_to_ptr.vmem [resolvable:$true] %s2225_s26 }
 0x101   :  { %2139 = vmatpush2.bf16.msra.mxu1 %v2872_v1  ;;  %v2959_v1 = vld [vmem:[#allocation5 + $0x7c0] ss:$24 sps:$4 sm:$0xff]   ;;  %s3005_s27 = scalar_lea.vmem %s2226_s26, 1536  ;;  %p3010_p11 = scmp.lt.s32.totalorder %s2226_s26, %s2226_s26 }
 0x102   :  { %2140 = vmatprep.subr.bf16.mxu1 %v2880_v2  ;;  %p3006_p10 = scmp.ne.s32.totalorder %s2226_s26, %s3005_s27  ;;  %p3011_p12 = scmp.lt.s32.totalorder %s3005_s27, %s3005_s27 }
 0x103   :  { %2098 = vmatpush2.bf16.msra.mxu0 %v2875_v3 }
 0x104   :  { %2099 = vmatprep.subr.bf16.mxu0 %v2883_v4  ;;  %v2964_v4 = vld [vmem:[#allocation5 + $0x794] ss:$24 sps:$4 sm:$0xff]   ;;  %p3012_p13 = por %p3011_p12, %p3010_p11 }
 0x105   :  { %2141 = vmatpush2.bf16.msra.mxu1 %v2878_v5  ;;  %v354_v5 = vrot.slane %v3102_v63, %v353_v62 }
 0x106   :  { %2142 = vmatprep.subr.bf16.mxu1 %v2886_v6  ;;  %v358_v6 = vrot.slane %v3102_v63, %v357_v0  ;;  %p3013_p0 = pnand %p3012_p13, %p3006_p10 }
 0x107   :  { %2100 = vmatpush2.bf16.msra.mxu0 %v2881_v7  ;;  %v2962_v7 = vld [vmem:[#allocation5 + $0x790] ss:$24 sps:$4 sm:$0xff]  }
 0x108   :  { %2101 = vmatprep.subr.bf16.mxu0 %v2889_v8 }
 0x109   :  { %2143 = vmatpush2.bf16.msra.mxu1 %v2884_v9 }
 0x10a   :  { %2144 = vmatprep.subr.bf16.mxu1 %v2892_v10 }
 0x10b   :  { %2102 = vmatpush2.bf16.msra.mxu0 %v2887_v12 }
 0x10c   :  { %2103 = vmatprep.subr.bf16.mxu0 %v2895_v13 }
 0x10d   :  { %2145 = vmatpush2.bf16.msra.mxu1 %v2890_v15 }
 0x10e   :  { %2146 = vmatprep.subr.bf16.mxu1 %v2898_v16 }
 0x10f   :  { %2104 = vmatpush2.bf16.msra.mxu0 %v2893_v17 }
 0x110   :  { %2105 = vmatprep.subr.bf16.mxu0 %v2901_v18 }
 0x111   :  { %2147 = vmatpush2.bf16.msra.mxu1 %v2896_v19 }
 0x112   :  { %2148 = vmatprep.subr.bf16.mxu1 %v2904_v20 }
 0x113   :  { %2106 = vmatpush2.bf16.msra.mxu0 %v2899_v21 }
 0x114   :  { %2107 = vmatprep.subr.bf16.mxu0 %v2907_v23 }
 0x115   :  { %2149 = vmatpush2.bf16.msra.mxu1 %v2902_v24 }
 0x116   :  { %2150 = vmatprep.subr.bf16.mxu1 %v2910_v25 }
 0x117   :  { %2108 = vmatpush2.bf16.msra.mxu0 %v2905_v26 }
 0x118   :  { %2109 = vmatprep.subr.bf16.mxu0 %v2913_v27 }
 0x119   :  { %2151 = vmatpush2.bf16.msra.mxu1 %v2908_v28 }
 0x11a   :  { %2152 = vmatprep.subr.bf16.mxu1 %v2916_v29 }
 0x11b   :  { %2110 = vmatpush2.bf16.msra.mxu0 %v2911_v30 }
 0x11c   :  { %2165 = vmatprep.subr.bf16.mxu0 %v2919_v31 }
 0x11d   :  { %2153 = vmatpush2.bf16.msra.mxu1 %v2914_v32 }
 0x11e   :  { %2112 = vmatmul.mubr.bf16.vlgmr.msra.gmra.mxu0 %v3073_v11  ;;  %v2934_v11 = vld [vmem:[#allocation5 + $0x674] ss:$24 sps:$4 sm:$0xff]   ;;  %v1855_v60 = vpop.f32.mrf.mxu0 }
 0x11f   :  { %2166 = vmatpush1.bf16.msra.mxu0 %v2917_v33  ;;  %2197 = vmatprep.mubr.bf16.mxu0 %v3080_v43  ;;  %v2937_v43 = vld [vmem:[#allocation5 + $0x644] ss:$24 sps:$4 sm:$0xff]   ;;  %v1898_v3 = vpop.f32.mrf.mxu1  ;;  %v1856_v10 = vadd.f32 %v1855_v60, %v354_v5  ;;  %v361_v33 = vsub.s32 2, %v3096_v58  ;;  %v373_v60 = vsub.s32 5, %v3096_v58 }
 0x120   :  { %2155 = vmatmul.mubr.bf16.vlgmr.msra.gmra.mxu1 %v3075_v14  ;;  %2167 = vmatprep.subr.bf16.mxu0 %v2922_v34  ;;  %v2935_v14 = vld [vmem:[#allocation5 + $0x640] ss:$24 sps:$4 sm:$0xff]   ;;  %v1857_v2 = vpop.f32.mrf.mxu0  ;;  %v365_v34 = vsub.s32 3, %v3096_v58 }
 0x121   :  { %v1900_v9 = vpop.f32.mrf.mxu1  ;;  %v1858_v12 = vadd.f32 %v1857_v2, %v358_v6  ;;  %v1899_v16 = vadd.f32 %v1898_v3, %v1856_v10 }
 0x122   :  { %v1859_v8 = vpop.f32.mrf.mxu0 }
 0x123   :  { %2168 = vmatpush1.bf16.msra.mxu0 %v2920_v35  ;;  %v1902_v15 = vpop.f32.mrf.mxu1  ;;  %v1860_v17 = vadd.f32 %v1859_v8, %v354_v5  ;;  %v1901_v19 = vadd.f32 %v1900_v9, %v1858_v12  ;;  %v362_v35 = vrot.slane %v3102_v63, %v361_v33 }
 0x124   :  { %2169 = vmatprep.subr.bf16.mxu0 %v2925_v36  ;;  %v1861_v13 = vpop.f32.mrf.mxu0 }
 0x125   :  { %v1862_v20 = vadd.f32 %v1861_v13, %v358_v6  ;;  %v1904_v23 = vpop.f32.mrf.mxu1  ;;  %v1903_v25 = vadd.f32 %v1902_v15, %v1860_v17 }
 0x127   :  { %2170 = vmatpush1.bf16.msra.mxu0 %v2923_v37  ;;  %v1905_v28 = vadd.f32 %v1904_v23, %v1862_v20  ;;  %v366_v37 = vrot.slane %v3102_v63, %v365_v34 }
 0x128   :  { %2171 = vmatprep.subr.bf16.mxu0 %v2928_v38 }
 0x12b   :  { %2172 = vmatpush1.bf16.msra.mxu0 %v2926_v39 }
 0x12c   :  { %2173 = vmatprep.subr.bf16.mxu0 %v2931_v40 }
 0x12f   :  { %2174 = vmatpush1.bf16.msra.mxu0 %v2929_v41 }
 0x130   :  { %2175 = vmatprep.subr.bf16.mxu0 %v2934_v11 }
 0x133   :  { %2176 = vmatpush1.bf16.msra.mxu0 %v2932_v49 }
 0x134   :  { %2177 = vmatprep.subr.bf16.mxu0 %v2937_v43 }
 0x137   :  { %2178 = vmatpush1.bf16.msra.mxu0 %v2935_v14 }
 0x138   :  { %2179 = vmatprep.subr.bf16.mxu0 %v2940_v42 }
 0x13b   :  { %2180 = vmatpush1.bf16.msra.mxu0 %v2938_v44 }
 0x13c   :  { %2181 = vmatprep.subr.bf16.mxu0 %v2943_v45 }
 0x13f   :  { %2182 = vmatpush2.bf16.msra.mxu0 %v2941_v55 }
 0x140   :  { %2183 = vmatprep.subr.bf16.mxu0 %v2946_v46 }
 0x143   :  { %2184 = vmatpush2.bf16.msra.mxu0 %v2944_v47 }
 0x144   :  { %2185 = vmatprep.subr.bf16.mxu0 %v2949_v48 }
 0x147   :  { %2186 = vmatpush2.bf16.msra.mxu0 %v2947_v50 }
 0x148   :  { %2187 = vmatprep.subr.bf16.mxu0 %v2952_v51 }
 0x14b   :  { %2188 = vmatpush2.bf16.msra.mxu0 %v2950_v52 }
 0x14c   :  { %2189 = vmatprep.subr.bf16.mxu0 %v2955_v53 }
 0x14f   :  { %2190 = vmatpush2.bf16.msra.mxu0 %v2953_v56 }
 0x150   :  { %2191 = vmatprep.subr.bf16.mxu0 %v2958_v57 }
 0x153   :  { %2192 = vmatpush2.bf16.msra.mxu0 %v2956_v59  ;;  %v369_v59 = vsub.s32 4, %v3096_v58 }
 0x154   :  { %2193 = vmatprep.subr.bf16.mxu0 %v2961_v61 }
 0x155   :  { %v370_v0 = vrot.slane %v3102_v63, %v369_v59 }
 0x157   :  { %2194 = vmatpush2.bf16.msra.mxu0 %v2959_v1  ;;  %v374_v1 = vrot.slane %v3102_v63, %v373_v60 }
 0x158   :  { %2195 = vmatprep.subr.bf16.mxu0 %v2964_v4 }
 0x15b   :  { %2196 = vmatpush2.bf16.msra.mxu0 %v2962_v7 }
 0x15e   :  { %v1941_v18 = vpop.f32.mrf.mxu0  ;;  %2198 = vmatmul.mubr.bf16.vlgmr.msra.gmra.mxu0 %v3083_v22 }
 0x15f   :  { %v1942_v21 = vadd.f32 %v1941_v18, %v1899_v16 }
 0x160   :  { %v1943_v24 = vpop.f32.mrf.mxu0  ;;  %v1984_v32 = vpop.f32.mrf.mxu1 }
 0x161   :  { %2208 = vst [vmem:[#allocation7] sm:$0xff] %v1942_v21  ;;  %v1944_v26 = vadd.f32 %v1943_v24, %v1901_v19  ;;  %v1985_v38 = vadd.f32 %v1984_v32, %v362_v35 }
 0x162   :  { %v1945_v27 = vpop.f32.mrf.mxu0  ;;  %v1986_v22 = vpop.f32.mrf.mxu1 }
 0x163   :  { %2209 = vst [vmem:[#allocation7 + $0x8] sm:$0xff] %v1944_v26  ;;  %v1946_v29 = vadd.f32 %v1945_v27, %v1903_v25  ;;  %v1987_v40 = vadd.f32 %v1986_v22, %v366_v37 }
 0x164   :  { %v1947_v30 = vpop.f32.mrf.mxu0  ;;  %v1988_v36 = vpop.f32.mrf.mxu1 }
 0x165   :  { %2214 = vst [vmem:[#allocation7 + $0x30] sm:$0xff] %v1946_v29  ;;  %v1948_v31 = vadd.f32 %v1947_v30, %v1905_v28  ;;  %v1989_v14 = vadd.f32 %v1988_v36, %v362_v35 }
 0x166   :  { %v1990_v39 = vpop.f32.mrf.mxu1 }
 0x167   :  { %2215 = vst [vmem:[#allocation7 + $0x38] sm:$0xff] %v1948_v31  ;;  %v1991_v46 = vadd.f32 %v1990_v39, %v366_v37 }
 0x19e   :  { %v2027_v41 = vpop.f32.mrf.mxu0 }
 0x19f   :  { %v2028_v11 = vadd.f32 %v2027_v41, %v1985_v38 }
 0x1a0   :  { %v2029_v49 = vpop.f32.mrf.mxu0  ;;  %v2070_v43 = vpop.f32.mrf.mxu1 }
 0x1a1   :  { %v2030_v42 = vadd.f32 %v2029_v49, %v1987_v40  ;;  %v2071_v44 = vadd.f32 %v2070_v43, %v2028_v11 }
 0x1a2   :  { %v2031_v45 = vpop.f32.mrf.mxu0  ;;  %v2072_v55 = vpop.f32.mrf.mxu1 }
 0x1a3   :  { %2210 = vst [vmem:[#allocation7 + $0x10] sm:$0xff] %v2071_v44  ;;  %v2032_v47 = vadd.f32 %v2031_v45, %v1989_v14  ;;  %v2073_v48 = vadd.f32 %v2072_v55, %v2030_v42 }
 0x1a4   :  { %v2033_v50 = vpop.f32.mrf.mxu0  ;;  %v2074_v51 = vpop.f32.mrf.mxu1 }
 0x1a5   :  { %2211 = vst [vmem:[#allocation7 + $0x18] sm:$0xff] %v2073_v48  ;;  %v2034_v52 = vadd.f32 %v2033_v50, %v1991_v46  ;;  %v2075_v53 = vadd.f32 %v2074_v51, %v2032_v47 }
 0x1a6   :  { %v2076_v54 = vpop.f32.mrf.mxu1 }
 0x1a7   :  { %2216 = vst [vmem:[#allocation7 + $0x40] sm:$0xff] %v2075_v53  ;;  %v2077_v56 = vadd.f32 %v2076_v54, %v2034_v52 }
 0x1a9   :  { %2217 = vst [vmem:[#allocation7 + $0x48] sm:$0xff] %v2077_v56 }
 0x1de   :  { %v2113_v57 = vpop.f32.mrf.mxu0 }
 0x1df   :  { %v2114_v4 = vadd.f32 %v2113_v57, %v370_v0 }
 0x1e0   :  { %v2115_v61 = vpop.f32.mrf.mxu0  ;;  %v2156_v62 = vpop.f32.mrf.mxu1 }
 0x1e1   :  { %v2116_v5 = vadd.f32 %v2115_v61, %v374_v1  ;;  %v2157_v8 = vadd.f32 %v2156_v62, %v2114_v4 }
 0x1e2   :  { %v2117_v2 = vpop.f32.mrf.mxu0  ;;  %v2158_v3 = vpop.f32.mrf.mxu1 }
 0x1e3   :  { %v2118_v9 = vadd.f32 %v2117_v2, %v370_v0  ;;  %v2159_v12 = vadd.f32 %v2158_v3, %v2116_v5 }
 0x1e4   :  { %v2119_v6 = vpop.f32.mrf.mxu0  ;;  %v2160_v7 = vpop.f32.mrf.mxu1 }
 0x1e5   :  { %v2120_v13 = vadd.f32 %v2119_v6, %v374_v1  ;;  %v2161_v17 = vadd.f32 %v2160_v7, %v2118_v9 }
 0x1e6   :  { %v2162_v16 = vpop.f32.mrf.mxu1 }
 0x1e7   :  { %v2163_v63 = vadd.f32 %v2162_v16, %v2120_v13 }
 0x21e   :  { %v2199_v10 = vpop.f32.mrf.mxu0 }
 0x21f   :  { %v2200_v15 = vadd.f32 %v2199_v10, %v2157_v8 }
 0x220   :  { %v2201_v58 = vpop.f32.mrf.mxu0 }
 0x221   :  { %2212 = vst [vmem:[#allocation7 + $0x20] sm:$0xff] %v2200_v15  ;;  %v2202_v18 = vadd.f32 %v2201_v58, %v2159_v12 }
 0x222   :  { %v2203_v19 = vpop.f32.mrf.mxu0 }
 0x223   :  { %2213 = vst [vmem:[#allocation7 + $0x28] sm:$0xff] %v2202_v18  ;;  %v2204_v20 = vadd.f32 %v2203_v19, %v2161_v17 }
 0x224   :  { %v2205_v21 = vpop.f32.mrf.mxu0 }
 0x225   :  { %2218 = vst [vmem:[#allocation7 + $0x50] sm:$0xff] %v2204_v20  ;;  %v2206_v23 = vadd.f32 %v2205_v21, %v2163_v63 }
 0x227   :  { %2219 = vst [vmem:[#allocation7 + $0x58] sm:$0xff] %v2206_v23 }
 0x228   :  { %3016 = shalt.err (!%p3013_p0)
}
 0x229   :  { %2231 = dma.vmem_to_hbm [thread:$0]  %s2226_s26, 1536, %s3125_s3, [#allocation4], %s3032_s15, %s3032_s15, %s3033_s16  }
 0x22a   :  { %3029 = dma.done.wait [#allocation4], 1536  }
 0x22b   :  { %3030 = vsyncadd [#allocation4], 4294965760 }
 0x22c   :  { %2235 = vsyncpa [#allocation3], 1 }
 0x22d   :  { %2236 = vsyncpa [#allocation6], 1 }
 0x22e   :  { %2237 = vsyncpa [#allocation4], 1 }

</bundles_post_ra>
